<compile_context>
chip_gen: v7x
topology: tpu7x:2x2x1
jax: 0.10.0
libtpu: 0.0.40
codegen_flags: <defaults>
</compile_context>

<pallas_src>
import jax
import jax.numpy as jnp
from jax.experimental import pallas as pl
from jax.experimental.pallas import tpu as pltpu


# ----------------------------- Pallas kernel ------------------------------ #
def _r3m_frames_kernel(p_ref, w1_ref, b1_ref, w2_ref, b2_ref, o_ref):
    """Feature extraction for a block of F frames.

    p_ref : (F*NP, PD)  patchified frames, values in [0, 1]
                        (the R3M *255 scale is pre-folded into w1)
    w1_ref: (PD, D)     patch-embed weight (already scaled by 255)
    b1_ref: (1, D)      patch-embed bias
    w2_ref: (D, HID)    head weight
    b2_ref: (1, HID)    head bias
    o_ref : (F, HID)    output features for these F frames
    """
    F = o_ref.shape[0]
    NP = p_ref.shape[0] // F

    # Patch-embed: one big MXU matmul over all patches of the F frames.
    h = jnp.dot(p_ref[...], w1_ref[...], preferred_element_type=jnp.float32)
    h = jnp.maximum(h + b1_ref[...], 0.0)                       # bias + ReLU

    # Per-frame global average pool over patches (XLU reduction slot).
    pooled = jnp.mean(h.reshape(F, NP, h.shape[-1]), axis=1)    # (F, D)

    # Head: (F, D) @ (D, HID) on the MXU.
    feat = jnp.dot(pooled, w2_ref[...],
                   preferred_element_type=jnp.float32) + b2_ref[...]
    o_ref[...] = feat.astype(o_ref.dtype)


# ------------------------------ JAX wrapper -------------------------------- #
def r3m_feature_extractor(x, params, patch_size, frames_per_block=None,
                          vmem_budget_bytes=8 << 20):
    """x: (B, T, C, H, W) float32 in [0, 1]  ->  (B, T, hidden_dim)."""
    B, T, C, H, W = x.shape
    P = patch_size
    assert H % P == 0 and W % P == 0
    w1, b1, w2, b2 = params
    PD, D = w1.shape
    HID = w2.shape[1]
    assert PD == C * P * P

    # Fold the R3M "* 255.0" into the first-layer weight: mathematically
    # identical since the scale precedes the first nonlinearity, and it is a
    # one-time transform of the (small) weight, not a per-activation op.
    w1_scaled = (w1 * jnp.float32(255.0)).astype(jnp.float32)

    N = B * T                        # total frames
    NP = (H // P) * (W // P)         # patches per frame

    # Patchify each frame (im2col of the stride-P conv stem), flattened to a
    # lane-dense 2-D slab so the kernel's input block is 2-D.
    # TODO(synk): at real R3M resolutions (224x224x3) this transpose
    # materializes a full HBM copy; fuse it into the pallas_call input pipeline
    # (allow_input_fusion) or do the im2col in-kernel from memory_space=pl.ANY.
    xf = x.reshape(N, C, H // P, P, W // P, P)
    xf = jnp.transpose(xf, (0, 2, 4, 1, 3, 5))           # (N, h, w, C, P, P)
    patches = xf.reshape(N * NP, PD)                     # (N*NP, C*P*P)

    # Frames per grid step: multiple of 8 (sublane-dense output stores),
    # capped by the VMEM budget (resident weights + double-buffered input
    # block), and kept small enough to leave >= 2 grid steps so both
    # TensorCores (v7x megacore) get work.
    if frames_per_block is None:
        weight_bytes = 4 * (PD * D + D + D * HID + HID)
        per_frame_bytes = 4 * NP * PD
        fit = max(8, (vmem_budget_bytes - weight_bytes) // (2 * per_frame_bytes))
        half = pl.cdiv(N, 2)
        frames_per_block = max(8, (min(int(fit), int(half)) // 8) * 8)
    F = int(frames_per_block)

    n_blocks = pl.cdiv(N, F)
    Npad = n_blocks * F
    if Npad != N:
        patches = jnp.pad(patches, ((0, (Npad - N) * NP), (0, 0)))

    out = pl.pallas_call(
        _r3m_frames_kernel,
        out_shape=jax.ShapeDtypeStruct((Npad, HID), jnp.float32),
        grid=(n_blocks,),
        in_specs=[
            pl.BlockSpec((F * NP, PD), lambda i: (i, 0)),   # patches (pipelined)
            pl.BlockSpec((PD, D), lambda i: (0, 0)),        # w1 (resident)
            pl.BlockSpec((1, D), lambda i: (0, 0)),         # b1 (resident)
            pl.BlockSpec((D, HID), lambda i: (0, 0)),       # w2 (resident)
            pl.BlockSpec((1, HID), lambda i: (0, 0)),       # b2 (resident)
        ],
        out_specs=pl.BlockSpec((F, HID), lambda i: (i, 0)),
        compiler_params=pltpu.CompilerParams(
            dimension_semantics=("parallel",)),
    )(patches, w1_scaled, b1, w2, b2)

    # Matches: stack over T then transpose(0,1) back -> (B, T, hidden_dim).
    return out[:N].reshape(B, T, HID)


def make_params(key, patch_dim, embed_dim, hidden_dim):
    """Deterministic synthetic backbone weights (not a checkpoint load)."""
    k1, k2, k3, k4 = jax.random.split(key, 4)
    w1 = jax.random.normal(k1, (patch_dim, embed_dim), jnp.float32) * 0.02
    b1 = jax.random.normal(k2, (1, embed_dim), jnp.float32) * 0.01
    w2 = jax.random.normal(k3, (embed_dim, hidden_dim), jnp.float32) * 0.02
    b2 = jax.random.normal(k4, (1, hidden_dim), jnp.float32) * 0.01
    return w1, b1, w2, b2


# --------------------------------- main ------------------------------------ #
if __name__ == "__main__":
    # TODO(synk): pretrained R3M-ResNet18 and the DistilBERT text branch
    # (get_text_feature / txt_to_img_similarity) are checkpoint-dependent and
    # are not translated; synthetic weights stand in for the frozen backbone.
    key = jax.random.PRNGKey(0)
    B, T, C, H, W = 2, 8, 3, 16, 16          # small video batch (N = 16 frames)
    P = 4                                    # patch size (conv-stem stride)
    EMBED = 128                              # patch-embed width
    HIDDEN = 128                             # stand-in for r3m_hidden_dim (512)

    kx, kp = jax.random.split(key)
    x = jax.random.uniform(kx, (B, T, C, H, W), jnp.float32)   # values in [0,1]
    params = make_params(kp, C * P * P, EMBED, HIDDEN)

    feats = r3m_feature_extractor(x, params, P)
    feats = jax.block_until_ready(feats)
    assert feats.shape == (B, T, HIDDEN), feats.shape
    assert feats.dtype == jnp.float32
    print("KERNEL_OK")
</pallas_src>

<mosaic_0001>
module attributes {stable_mosaic.version = 11 : i64} {
  func.func @_r3m_frames_kernel(%arg0: i32, %arg1: memref<128x48xf32, #tpu.memory_space<vmem>>, %arg2: memref<48x128xf32, #tpu.memory_space<vmem>>, %arg3: memref<1x128xf32, #tpu.memory_space<vmem>>, %arg4: memref<128x128xf32, #tpu.memory_space<vmem>>, %arg5: memref<1x128xf32, #tpu.memory_space<vmem>>, %arg6: memref<8x128xf32, #tpu.memory_space<vmem>>) attributes {dimension_semantics = [#tpu.dimension_semantics<parallel>], iteration_bounds = array<i64: 2>, scalar_prefetch = 0 : i64, scratch_operands = 0 : i64, tpu.core_type = #tpu.core_type<tc>, window_params = [{transform_indices = @transform_0, window_bounds = array<i64: 128, 48>}, {pipeline_mode = #tpu.pipeline_mode<synchronous>, transform_indices = @transform_1, window_bounds = array<i64: 48, 128>}, {pipeline_mode = #tpu.pipeline_mode<synchronous>, transform_indices = @transform_2, window_bounds = array<i64: 1, 128>}, {pipeline_mode = #tpu.pipeline_mode<synchronous>, transform_indices = @transform_3, window_bounds = array<i64: 128, 128>}, {pipeline_mode = #tpu.pipeline_mode<synchronous>, transform_indices = @transform_4, window_bounds = array<i64: 1, 128>}, {transform_indices = @transform_5, window_bounds = array<i64: 8, 128>}]} {
    %c0 = arith.constant 0 : index
    %c0_0 = arith.constant 0 : index
    %0 = vector.load %arg1[%c0, %c0_0] : memref<128x48xf32, #tpu.memory_space<vmem>>, vector<128x48xf32>
    %c0_1 = arith.constant 0 : index
    %c0_2 = arith.constant 0 : index
    %1 = vector.load %arg2[%c0_1, %c0_2] : memref<48x128xf32, #tpu.memory_space<vmem>>, vector<48x128xf32>
    %cst = arith.constant dense<0.000000e+00> : vector<128x128xf32>
    %2 = tpu.matmul %0, %1, %cst {dimension_numbers = #tpu.dot_dimension_numbers<[1], [0], [0], [1], [0, 0, 1, 1], [], []>} : vector<128x48xf32>, vector<48x128xf32>, vector<128x128xf32> -> vector<128x128xf32>
    %c0_3 = arith.constant 0 : index
    %c0_4 = arith.constant 0 : index
    %3 = vector.load %arg3[%c0_3, %c0_4] : memref<1x128xf32, #tpu.memory_space<vmem>>, vector<1x128xf32>
    %4 = vector.broadcast %3 : vector<1x128xf32> to vector<128x128xf32>
    %5 = arith.addf %2, %4 : vector<128x128xf32>
    %cst_5 = arith.constant 0.000000e+00 : f32
    %6 = vector.broadcast %cst_5 : f32 to vector<128x128xf32>
    %7 = arith.maximumf %5, %6 : vector<128x128xf32>
    %8 = vector.shape_cast %7 : vector<128x128xf32> to vector<8x16x128xf32>
    %cst_6 = arith.constant dense<0.000000e+00> : vector<8x128xf32>
    %9 = vector.multi_reduction <add>, %8, %cst_6 [1] : vector<8x16x128xf32> to vector<8x128xf32>
    %cst_7 = arith.constant 1.600000e+01 : f32
    %10 = vector.broadcast %cst_7 : f32 to vector<8x128xf32>
    %11 = arith.divf %9, %10 : vector<8x128xf32>
    %c0_8 = arith.constant 0 : index
    %c0_9 = arith.constant 0 : index
    %12 = vector.load %arg4[%c0_8, %c0_9] : memref<128x128xf32, #tpu.memory_space<vmem>>, vector<128x128xf32>
    %cst_10 = arith.constant dense<0.000000e+00> : vector<8x128xf32>
    %13 = tpu.matmul %11, %12, %cst_10 {dimension_numbers = #tpu.dot_dimension_numbers<[1], [0], [0], [1], [0, 0, 1, 1], [], []>} : vector<8x128xf32>, vector<128x128xf32>, vector<8x128xf32> -> vector<8x128xf32>
    %c0_11 = arith.constant 0 : index
    %c0_12 = arith.constant 0 : index
    %14 = vector.load %arg5[%c0_11, %c0_12] : memref<1x128xf32, #tpu.memory_space<vmem>>, vector<1x128xf32>
    %15 = vector.broadcast %14 : vector<1x128xf32> to vector<8x128xf32>
    %16 = arith.addf %13, %15 : vector<8x128xf32>
    %c0_13 = arith.constant 0 : index
    %c0_14 = arith.constant 0 : index
    %17 = vector.load %arg6[%c0_13, %c0_14] : memref<8x128xf32, #tpu.memory_space<vmem>>, vector<8x128xf32>
    tpu.vector_store %arg6[%c0_13, %c0_14], %16 {strides = array<i32>} : memref<8x128xf32, #tpu.memory_space<vmem>>, vector<8x128xf32>,
    return
  }
  func.func @transform_0(%arg0: i32) -> (i32, i32) {
    %c0_i32 = arith.constant 0 : i32
    %c0_i32_0 = arith.constant 0 : i32
    return %arg0, %c0_i32 : i32, i32
  }
  func.func @transform_1(%arg0: i32) -> (i32, i32) {
    %c0_i32 = arith.constant 0 : i32
    %c0_i32_0 = arith.constant 0 : i32
    %c0_i32_1 = arith.constant 0 : i32
    return %c0_i32, %c0_i32_0 : i32, i32
  }
  func.func @transform_2(%arg0: i32) -> (i32, i32) {
    %c0_i32 = arith.constant 0 : i32
    %c0_i32_0 = arith.constant 0 : i32
    %c0_i32_1 = arith.constant 0 : i32
    return %c0_i32, %c0_i32_0 : i32, i32
  }
  func.func @transform_3(%arg0: i32) -> (i32, i32) {
    %c0_i32 = arith.constant 0 : i32
    %c0_i32_0 = arith.constant 0 : i32
    %c0_i32_1 = arith.constant 0 : i32
    return %c0_i32, %c0_i32_0 : i32, i32
  }
  func.func @transform_4(%arg0: i32) -> (i32, i32) {
    %c0_i32 = arith.constant 0 : i32
    %c0_i32_0 = arith.constant 0 : i32
    %c0_i32_1 = arith.constant 0 : i32
    return %c0_i32, %c0_i32_0 : i32, i32
  }
  func.func @transform_5(%arg0: i32) -> (i32, i32) {
    %c0_i32 = arith.constant 0 : i32
    %c0_i32_0 = arith.constant 0 : i32
    return %arg0, %c0_i32 : i32, i32
  }
}

</mosaic_0001>

<bundles_post_ra>
// kernel: tpu_custom_call.1
= control target key start
LH: loop header
LB: loop body
LE: loop exit
PB: predicated region body
PF: predicated region fallthrough
CT: control target
= control target key end

     0   :  { %10 = vsyncpa [#allocation3], 0  ;;  %s1257_s0 = inlined_call_operand.vmem [shape: f32[256,48], index: 0, kind: input, shape index: {}]   ;;  %s1258_s1 = inlined_call_operand.vmem [shape: f32[48,128], index: 1, kind: input, shape index: {}]   ;;  %s1259_s2 = inlined_call_operand.vmem [shape: f32[1,128], index: 2, kind: input, shape index: {}]   ;;  %s1260_s3 = inlined_call_operand.vmem [shape: f32[128,128], index: 3, kind: input, shape index: {}]   ;;  %s1261_s4 = inlined_call_operand.vmem [shape: f32[1,128], index: 4, kind: input, shape index: {}]   ;;  %s1262_s5 = inlined_call_operand.hbm [shape: f32[16,128], index: 5, kind: output, shape index: {}]  }
   0x1   :  { %12 = vsyncpa [#allocation3 + $0x1], 0  ;;  %s1034_s18 = smov 0   ;;  %s1036_s19 = smov 0  }
   0x2   :  { %s1038_s20 = smov 0   ;;  %s1040_s21 = smov 0  }
   0x3 LB: > { %s1055_s22 = sadd.s32 4294967295, %s998_s21   ;;  %s719_s23 = sadd.s32 4294967294, %s998_s21   ;;  %s998_s21 = sphi %s1040_s21, %s1268_s21   ;;  %s994_s20 = sphi %s1038_s20, %s1267_s20   ;;  %s990_s19 = sphi %s1036_s19, %s1266_s19   ;;  %s986_s18 = sphi %s1034_s18, %s1265_s18  }
   0x4   : > { %s1059_s24 = sadd.s32 1, %s998_s21   ;;  %s135_s25 = sadd.s32 1, %s994_s20 }
   0x5   : > { %s132_s26 = ssub.s32 %s998_s21, %s1059_s24  ;;  %p145_p0 = scmp.ne.s32.totalorder %s994_s20, %s990_s19 }
   0x6   : > { %p133_p1 = scmp.eq.s32.totalorder %s132_s26, 0  ;;  %p146_p2 = scmp.eq.s32.totalorder %s1055_s22, 1 }
   0x7   : > { %p151_p3 = scmp.ne.s32.totalorder %s990_s19, %s986_s18  ;;  %p152_p4 = scmp.eq.s32.totalorder %s719_s23, 1 }
   0x8   : > { %s1070_s27 = scalar_select %p133_p1, %s994_s20, %s135_s25  }
   0x9   : > { %p1072_p5 = por %p146_p2, %p145_p0  ;;  %p1076_p6 = por %p152_p4, %p151_p3 }
   0xa   : > { %p722_p7 = scmp.ge.s32.totalorder %s998_s21, 1  ;;  %p191_p8 = scmp.lt.s32.totalorder %s998_s21, 3 }
   0xc   : > { %p192_p9 = pnand %p722_p7, %p191_p8 }
   0xd   : > { %v241_v0 = vld [vmem:[%s1258_s1] sm:$0xff] (!%p192_p9)  ;;  %v242_v1 = vld [vmem:[%s1258_s1 + $0x8] sm:$0xff] (!%p192_p9)  ;;  %v243_v2 = vld [vmem:[%s1258_s1 + $0x10] sm:$0xff] (!%p192_p9)  ;;  %s724_s11 = sshll.u32 (!%p192_p9), %s1055_s22, 4  ;;  %vm254_vm0 = vcmask (!%p192_p9), 392192   ;;  %v1000_v28 = vmov (!%p192_p9), 0.0|0.0  }
   0xe   : > { %195 = sbr.rel (%p192_p9) target bundleno = 518 (0x206), region = 40  ;;  %v858_v3 = vpack.c.bf16 (!%p192_p9), %v242_v1, %v241_v0  ;;  %v244_v4 = vld [vmem:[%s1258_s1 + $0x18] sm:$0xff] (!%p192_p9)  ;;  %p220_p10 = scmp.lt.s32.totalorder (!%p192_p9), %s724_s11, 31  ;;  %v245_v6 = vld [vmem:[%s1258_s1 + $0x20] sm:$0xff] (!%p192_p9)  ;;  %v246_v7 = vld [vmem:[%s1258_s1 + $0x28] sm:$0xff] (!%p192_p9)  ;;  %870 = vmatprep.subr.bf16.mxu1 (!%p192_p9), %v1000_v28  ;;  %vm1001_vm1 = vmmov (!%p192_p9), 0  }
   0xf   : > { %v862_v5 = vpack.c.bf16 (!%p192_p9), %v244_v4, %v243_v2  ;;  %v866_v8 = vpack.c.bf16 (!%p192_p9), %v246_v7, %v245_v6  ;;  %v529_v25 = vld [vmem:[%s1260_s3] sm:$0xff] (!%p192_p9)  ;;  %v530_v26 = vld [vmem:[%s1260_s3 + $0x8] sm:$0xff] (!%p192_p9)  ;;  %v531_v29 = vld [vmem:[%s1260_s3 + $0x10] sm:$0xff] (!%p192_p9)  ;;  %v1002_v49 = vmov (!%p192_p9), 0.0   ;;  %vm560_vm2 = vcmask (!%p192_p9), 1041409   ;;  %s216_s8 = sand.u32 (!%p192_p9), 1, %s990_s19  }
  0x10   : > { %859 = vmatprep.subr.bf16.mxu0 (!%p192_p9), %v858_v3  ;;  %v871_v27 = vpack.c.bf16 (!%p192_p9), %v530_v26, %v529_v25  ;;  %v532_v30 = vld [vmem:[%s1260_s3 + $0x18] sm:$0xff] (!%p192_p9)  ;;  %v533_v32 = vld [vmem:[%s1260_s3 + $0x20] sm:$0xff] (!%p192_p9)  ;;  %v534_v33 = vld [vmem:[%s1260_s3 + $0x28] sm:$0xff] (!%p192_p9)  ;;  %855 = vmatprep.mubr.msk.f32.mxu1 (!%p192_p9), %vm1001_vm1, %v1002_v49  ;;  %vm562_vm3 = vcmask (!%p192_p9), 1042434   ;;  %vm564_vm4 = vcmask (!%p192_p9), 1043459   ;;  %vm566_vm5 = vcmask (!%p192_p9), 1044484  }
  0x11   : > { %861 = vmatpush3.bf16.msra.mxu0 (!%p192_p9), %v858_v3  ;;  %v874_v31 = vpack.c.bf16 (!%p192_p9), %v532_v30, %v531_v29  ;;  %v877_v34 = vpack.c.bf16 (!%p192_p9), %v534_v33, %v533_v32  ;;  %v535_v35 = vld [vmem:[%s1260_s3 + $0x30] sm:$0xff] (!%p192_p9)  ;;  %v536_v36 = vld [vmem:[%s1260_s3 + $0x38] sm:$0xff] (!%p192_p9)  ;;  %v537_v38 = vld [vmem:[%s1260_s3 + $0x40] sm:$0xff] (!%p192_p9)  ;;  %vm568_vm6 = vcmask (!%p192_p9), 1045509   ;;  %vm570_vm7 = vcmask (!%p192_p9), 1046534   ;;  %s723_s9 = sshll.u32 (!%p192_p9), %s216_s8, 3 }
  0x12   : > { %863 = vmatprep.subr.bf16.mxu0 (!%p192_p9), %v862_v5  ;;  %872 = vmatpush3.bf16.msra.mxu1 (!%p192_p9), %v871_v27  ;;  %v880_v37 = vpack.c.bf16 (!%p192_p9), %v536_v36, %v535_v35  ;;  %v538_v39 = vld [vmem:[%s1260_s3 + $0x48] sm:$0xff] (!%p192_p9)  ;;  %v539_v41 = vld [vmem:[%s1260_s3 + $0x50] sm:$0xff] (!%p192_p9)  ;;  %v540_v42 = vld [vmem:[%s1260_s3 + $0x58] sm:$0xff] (!%p192_p9)  ;;  %vm572_vm8 = vcmask (!%p192_p9), 1047559   ;;  %s745_s12 = sshll.u32 (!%p192_p9), %s1055_s22, 7  ;;  %s218_s13 = scalar_lea.vmem (!%p192_p9), [#allocation2], %s723_s9 }
  0x13   : > { %873 = vmatprep.subr.bf16.mxu1 (!%p192_p9), %v1000_v28  ;;  %v883_v40 = vpack.c.bf16 (!%p192_p9), %v538_v39, %v537_v38  ;;  %v886_v43 = vpack.c.bf16 (!%p192_p9), %v540_v42, %v539_v41  ;;  %v541_v44 = vld [vmem:[%s1260_s3 + $0x60] sm:$0xff] (!%p192_p9)  ;;  %v542_v45 = vld [vmem:[%s1260_s3 + $0x68] sm:$0xff] (!%p192_p9)  ;;  %v543_v46 = vld [vmem:[%s1260_s3 + $0x70] sm:$0xff] (!%p192_p9)  ;;  %s660_s14 = sshll.u32 (!%p192_p9), %s218_s13, 4  ;;  %s1215_s17 = scalar_lea.hbm (!%p192_p9), %s1262_s5, %s745_s12  ;;  %s1217_s14 = int_to_ptr.vmem [resolvable:$true] %s660_s14 }
  0x14   : > { %v889_v47 = vpack.c.bf16 (!%p192_p9), %v542_v45, %v541_v44  ;;  %v544_v48 = vld [vmem:[%s1260_s3 + $0x78] sm:$0xff] (!%p192_p9)  ;;  %v1189_v51 = vld [vmem:[%s1259_s2] ss:$0 sm:$0xff] (!%p192_p9)  ;;  %s936_s25 = scalar_lea.vmem (!%p192_p9), %s1217_s14, 128  ;;  %s1003_s22 = smov (!%p192_p9), [#allocation2]  }
  0x15   : > { %s1270_s11 = smov (!%p220_p10, %s724_s11), 31  ;;  %865 = vmatpush3.bf16.msra.mxu0 %v862_v5  ;;  %v892_v50 = vpack.c.bf16 %v544_v48, %v543_v46  ;;  %p937_p11 = scmp.ne.s32.totalorder %s1217_s14, %s936_s25 }
  0x16   : > { %s725_s23 = sshll.u32 %s1270_s11, 3  ;;  %867 = vmatprep.subr.bf16.mxu0 %v866_v8  ;;  %875 = vmatpush3.bf16.msra.mxu1 %v874_v31  ;;  %s940_s26 = sshll.u32 %s1003_s22, 4  ;;  %s941_s26 = int_to_ptr.vmem [resolvable:$false] %s940_s26 }
  0x17   : > { %s1104_s30 = scalar_lea.vmem %s1257_s0, %s725_s23  ;;  %876 = vmatprep.subr.bf16.mxu1 %v1000_v28  ;;  %s647_s23 = scalar_lea.sflag [#allocation3], %s216_s8 }
  0x18   : > { %v225_v9 = vld [vmem:[%s1104_s30] sm:$0xff]  ;;  %v226_v10 = vld [vmem:[%s1104_s30 + $0x8] sm:$0xff]  ;;  %v227_v11 = vld [vmem:[%s1104_s30 + $0x10] sm:$0xff]  ;;  %p938_p12 = pnand %p937_p11, %p1072_p5  ;;  %p943_p0 = scmp.lt.s32.totalorder %s1217_s14, %s941_s26 }
  0x19   : > { %799 = vmatprep.mubr.msk.f32.mxu0 %vm254_vm0, %v225_v9  ;;  %869 = vmatpush3.bf16.msra.mxu0 %v866_v8  ;;  %v228_v12 = vld [vmem:[%s1104_s30 + $0x18] sm:$0xff]  ;;  %v229_v13 = vld [vmem:[%s1104_s30 + $0x20] sm:$0xff]  ;;  %v230_v14 = vld [vmem:[%s1104_s30 + $0x28] sm:$0xff] }
  0x1a   : > { %v231_v15 = vld [vmem:[%s1104_s30 + $0x30] sm:$0xff]  ;;  %v232_v16 = vld [vmem:[%s1104_s30 + $0x38] sm:$0xff]  ;;  %v233_v17 = vld [vmem:[%s1104_s30 + $0x40] sm:$0xff]  ;;  %878 = vmatpush3.bf16.msra.mxu1 %v877_v34  ;;  %p939_p13 = pneg %p938_p12 }
  0x1b   : > { %v234_v18 = vld [vmem:[%s1104_s30 + $0x48] sm:$0xff]  ;;  %v235_v19 = vld [vmem:[%s1104_s30 + $0x50] sm:$0xff]  ;;  %v236_v20 = vld [vmem:[%s1104_s30 + $0x58] sm:$0xff]  ;;  %879 = vmatprep.subr.bf16.mxu1 %v1000_v28 }
  0x1c   : > { %800 = vmatmul.mubr.msk.f32.vlgmr.msra.gmra.mrb[0].mxu0 %vm254_vm0, %v226_v10  ;;  %v237_v21 = vld [vmem:[%s1104_s30 + $0x60] sm:$0xff]  ;;  %v238_v22 = vld [vmem:[%s1104_s30 + $0x68] sm:$0xff]  ;;  %v239_v23 = vld [vmem:[%s1104_s30 + $0x70] sm:$0xff] }
  0x1d   : > { %802 = vmatprep.mubr.msk.f32.mxu0 %vm254_vm0, %v227_v11  ;;  %v240_v24 = vld [vmem:[%s1104_s30 + $0x78] sm:$0xff]  ;;  %s942_s30 = scalar_lea.vmem %s941_s26, 256 }
  0x1e   : > { %881 = vmatpush3.bf16.msra.mxu1 %v880_v37  ;;  %p944_p1 = scmp.lt.s32.totalorder %s942_s30, %s936_s25 }
  0x1f   : > { %882 = vmatprep.subr.bf16.mxu1 %v1000_v28 }
  0x20   : > { %803 = vmatmul.mubr.msk.f32.gmra.mrb[2].mxu0 %vm254_vm0, %v228_v12  ;;  %p945_p2 = por %p944_p1, %p943_p0 }
  0x21   : > { %805 = vmatprep.mubr.msk.f32.mxu0 %vm254_vm0, %v229_v13 }
  0x22   : > { %884 = vmatpush3.bf16.msra.mxu1 %v883_v40  ;;  %p946_p3 = pnand %p945_p2, %p939_p13 }
  0x23   : > { %885 = vmatprep.subr.bf16.mxu1 %v1000_v28 }
  0x24   : > { %806 = vmatmul.mubr.msk.f32.gmra.mrb[4].mxu0 %vm254_vm0, %v230_v14 }
  0x25   : > { %808 = vmatprep.mubr.msk.f32.mxu0 %vm254_vm0, %v231_v15 }
  0x26   : > { %887 = vmatpush3.bf16.msra.mxu1 %v886_v43 }
  0x27   : > { %888 = vmatprep.subr.bf16.mxu1 %v1000_v28 }
  0x28   : > { %809 = vmatmul.mubr.msk.f32.gmra.mrb[6].mxu0 %vm254_vm0, %v232_v16 }
  0x29   : > { %811 = vmatprep.mubr.msk.f32.mxu0 %vm254_vm0, %v233_v17 }
  0x2a   : > { %890 = vmatpush3.bf16.msra.mxu1 %v889_v47 }
  0x2b   : > { %891 = vmatprep.subr.bf16.mxu1 %v1000_v28 }
  0x2c   : > { %812 = vmatmul.mubr.msk.f32.gmra.mrb[8].mxu0 %vm254_vm0, %v234_v18 }
  0x2d   : > { %814 = vmatprep.mubr.msk.f32.mxu0 %vm254_vm0, %v235_v19 }
  0x2e   : > { %893 = vmatpush3.bf16.msra.mxu1 %v892_v50 }
  0x30   : > { %815 = vmatmul.mubr.msk.f32.gmra.mrb[10].mxu0 %vm254_vm0, %v236_v20 }
  0x31   : > { %817 = vmatprep.mubr.msk.f32.mxu0 %vm254_vm0, %v237_v21 }
  0x34   : > { %818 = vmatmul.mubr.msk.f32.gmra.mrb[12].mxu0 %vm254_vm0, %v238_v22 }
  0x35   : > { %820 = vmatprep.mubr.msk.f32.mxu0 %vm254_vm0, %v239_v23 }
  0x38   : > { %821 = vmatmul.mubr.msk.f32.gmra.mrb[14].mxu0 %vm254_vm0, %v240_v24 }
  0xef   : > { %v801_v52 = vpop.f32.mrb[0].mxu0 }
  0xf0   : > { %v375_v53 = vadd.f32 %v801_v52, %v1189_v51  ;;  %v369_v54 = vpop.f32.mrb[1].mxu0 }
  0xf1   : > { %v370_v55 = vadd.f32 %v1189_v51, %v369_v54 }
  0xf2   : > { %v449_v56 = vmax.f32 %v375_v53, 0.0 }
  0xf3   : > { %v448_v57 = vmax.f32 %v370_v55, 0.0  ;;  %v804_v58 = vpop.f32.mrb[2].mxu0 }
  0xf4   : > { %v385_v59 = vadd.f32 %v804_v58, %v1189_v51  ;;  %v379_v60 = vpop.f32.mrb[3].mxu0 }
  0xf5   : > { %v464_v61 = vadd.f32 %v449_v56, %v448_v57  ;;  %v380_v62 = vadd.f32 %v1189_v51, %v379_v60 }
  0xf6   : > { %v451_v63 = vmax.f32 %v385_v59, 0.0 }
  0xf7   : > { %v465_v0 = vrot.slane %v464_v61, 4  ;;  %v450_v1 = vmax.f32 %v380_v62, 0.0  ;;  %v807_v2 = vpop.f32.mrb[4].mxu0 }
  0xf8   : > { %v395_v3 = vadd.f32 %v807_v2, %v1189_v51  ;;  %v389_v4 = vpop.f32.mrb[5].mxu0 }
  0xf9   : > { %v466_v5 = vadd.f32 %v465_v0, %v464_v61  ;;  %v471_v6 = vadd.f32 %v451_v63, %v450_v1  ;;  %v390_v7 = vadd.f32 %v1189_v51, %v389_v4 }
  0xfa   : > { %v453_v8 = vmax.f32 %v395_v3, 0.0 }
  0xfb   : > { %v467_v9 = vrot.slane %v466_v5, 2  ;;  %v472_v10 = vrot.slane %v471_v6, 4  ;;  %v452_v11 = vmax.f32 %v390_v7, 0.0  ;;  %v810_v12 = vpop.f32.mrb[6].mxu0 }
  0xfc   : > { %v405_v13 = vadd.f32 %v810_v12, %v1189_v51  ;;  %v399_v14 = vpop.f32.mrb[7].mxu0 }
  0xfd   : > { %v468_v15 = vadd.f32 %v467_v9, %v466_v5  ;;  %v473_v16 = vadd.f32 %v472_v10, %v471_v6  ;;  %v478_v17 = vadd.f32 %v453_v8, %v452_v11  ;;  %v400_v18 = vadd.f32 %v1189_v51, %v399_v14 }
  0xfe   : > { %v455_v19 = vmax.f32 %v405_v13, 0.0 }
  0xff   : > { %v469_v20 = vrot.slane %v468_v15, 1  ;;  %v474_v21 = vrot.slane %v473_v16, 2  ;;  %v479_v22 = vrot.slane %v478_v17, 4  ;;  %v454_v23 = vmax.f32 %v400_v18, 0.0  ;;  %v813_v24 = vpop.f32.mrb[8].mxu0 }
 0x100   : > { %v415_v25 = vadd.f32 %v813_v24, %v1189_v51  ;;  %v409_v26 = vpop.f32.mrb[9].mxu0 }
 0x101   : > { %v475_v27 = vadd.f32 %v474_v21, %v473_v16  ;;  %v480_v28 = vadd.f32 %v479_v22, %v478_v17  ;;  %v485_v29 = vadd.f32 %v455_v19, %v454_v23  ;;  %v470_v30 = vadd.f32 %v469_v20, %v468_v15 }
 0x102   : > { %v457_v31 = vmax.f32 %v415_v25, 0.0  ;;  %v410_v32 = vadd.f32 %v1189_v51, %v409_v26 }
 0x103   : > { %v476_v33 = vrot.slane %v475_v27, 1  ;;  %v481_v34 = vrot.slane %v480_v28, 2  ;;  %v486_v35 = vrot.slane %v485_v29, 4  ;;  %v816_v36 = vpop.f32.mrb[10].mxu0  ;;  %v521_v44 = vmul.f32 0.0625, %v470_v30 }
 0x104   : > { %v456_v37 = vmax.f32 %v410_v32, 0.0  ;;  %v425_v38 = vadd.f32 %v816_v36, %v1189_v51  ;;  %v419_v39 = vpop.f32.mrb[11].mxu0 }
 0x105   : > { %v477_v40 = vadd.f32 %v476_v33, %v475_v27  ;;  %v482_v41 = vadd.f32 %v481_v34, %v480_v28  ;;  %v487_v42 = vadd.f32 %v486_v35, %v485_v29  ;;  %v420_v43 = vadd.f32 %v1189_v51, %v419_v39 }
 0x106   : > { %v492_v45 = vadd.f32 %v457_v31, %v456_v37  ;;  %v459_v46 = vmax.f32 %v425_v38, 0.0 }
 0x107   : > { %v522_v47 = vmul.f32 0.0625, %v477_v40  ;;  %v483_v48 = vrot.slane %v482_v41, 1  ;;  %v488_v49 = vrot.slane %v487_v42, 2  ;;  %v458_v50 = vmax.f32 %v420_v43, 0.0  ;;  %v819_v52 = vpop.f32.mrb[12].mxu0 }
 0x108   : > { %v493_v53 = vrot.slane %v492_v45, 4  ;;  %v435_v54 = vadd.f32 %v819_v52, %v1189_v51  ;;  %v429_v55 = vpop.f32.mrb[13].mxu0  ;;  %v743_v43 = vld [vmem:[%s1261_s4] ss:$0 sm:$0xff] }
 0x109   : > { %v561_v56 = vsel %vm560_vm2, %v522_v47, %v521_v44  ;;  %v484_v57 = vadd.f32 %v483_v48, %v482_v41  ;;  %v489_v58 = vadd.f32 %v488_v49, %v487_v42  ;;  %v499_v59 = vadd.f32 %v459_v46, %v458_v50 }
 0x10a   : > { %v494_v60 = vadd.f32 %v493_v53, %v492_v45  ;;  %v461_v61 = vmax.f32 %v435_v54, 0.0  ;;  %v430_v62 = vadd.f32 %v1189_v51, %v429_v55 }
 0x10b   : > { %v523_v63 = vmul.f32 0.0625, %v484_v57  ;;  %v490_v0 = vrot.slane %v489_v58, 1  ;;  %v500_v1 = vrot.slane %v499_v59, 4  ;;  %v822_v2 = vpop.f32.mrb[14].mxu0 }
 0x10c   : > { %v495_v3 = vrot.slane %v494_v60, 2  ;;  %v460_v4 = vmax.f32 %v430_v62, 0.0  ;;  %v445_v5 = vadd.f32 %v822_v2, %v1189_v51  ;;  %v439_v6 = vpop.f32.mrb[15].mxu0 }
 0x10d   : > { %v491_v7 = vadd.f32 %v490_v0, %v489_v58  ;;  %v501_v8 = vadd.f32 %v500_v1, %v499_v59  ;;  %v440_v9 = vadd.f32 %v1189_v51, %v439_v6  ;;  %v563_v10 = vsel %vm562_vm3, %v523_v63, %v561_v56 }
 0x10e   : > { %v496_v11 = vadd.f32 %v495_v3, %v494_v60  ;;  %v506_v12 = vadd.f32 %v461_v61, %v460_v4  ;;  %v463_v13 = vmax.f32 %v445_v5, 0.0 }
 0x10f   : > { %v524_v14 = vmul.f32 0.0625, %v491_v7  ;;  %v502_v15 = vrot.slane %v501_v8, 2  ;;  %v462_v16 = vmax.f32 %v440_v9, 0.0 }
 0x110   : > { %v497_v17 = vrot.slane %v496_v11, 1  ;;  %v507_v18 = vrot.slane %v506_v12, 4 }
 0x111   : > { %v503_v19 = vadd.f32 %v502_v15, %v501_v8  ;;  %v513_v20 = vadd.f32 %v463_v13, %v462_v16  ;;  %v565_v21 = vsel %vm564_vm4, %v524_v14, %v563_v10 }
 0x112   : > { %v498_v22 = vadd.f32 %v497_v17, %v496_v11  ;;  %v508_v23 = vadd.f32 %v507_v18, %v506_v12 }
 0x113   : > { %v504_v24 = vrot.slane %v503_v19, 1  ;;  %v514_v25 = vrot.slane %v513_v20, 4 }
 0x114   : > { %v525_v26 = vmul.f32 0.0625, %v498_v22  ;;  %v509_v51 = vrot.slane %v508_v23, 2 }
 0x115   : > { %v505_v27 = vadd.f32 %v504_v24, %v503_v19  ;;  %v515_v28 = vadd.f32 %v514_v25, %v513_v20 }
 0x116   : > { %v510_v29 = vadd.f32 %v509_v51, %v508_v23  ;;  %v567_v30 = vsel %vm566_vm5, %v525_v26, %v565_v21 }
 0x117   : > { %v526_v31 = vmul.f32 0.0625, %v505_v27  ;;  %v516_v32 = vrot.slane %v515_v28, 2 }
 0x118   : > { %v511_v33 = vrot.slane %v510_v29, 1 }
 0x119   : > { %v517_v34 = vadd.f32 %v516_v32, %v515_v28  ;;  %v569_v35 = vsel %vm568_vm6, %v526_v31, %v567_v30 }
 0x11a   : > { %v512_v36 = vadd.f32 %v511_v33, %v510_v29 }
 0x11b   : > { %v518_v37 = vrot.slane %v517_v34, 1 }
 0x11c   : > { %v527_v38 = vmul.f32 0.0625, %v512_v36 }
 0x11d   : > { %v519_v39 = vadd.f32 %v518_v37, %v517_v34 }
 0x11e   : > { %v571_v40 = vsel %vm570_vm7, %v527_v38, %v569_v35 }
 0x11f   : > { %v528_v41 = vmul.f32 0.0625, %v519_v39 }
 0x121   : > { %v573_v42 = vsel %vm572_vm8, %v528_v41, %v571_v40 }
 0x122   : > { %856 = vmatmul.mubr.f32.vlgmr.msra.gmra.mrb[0].mxu1 %v573_v42 }
 0x1f5   : > { %v641_v44 = vpop.f32.mrb[0].mxu1 }
 0x1f6   : > { %v642_v45 = vadd.f32 %v743_v43, %v641_v44  ;;  %v857_v46 = vpop.f32.mrb[1].mxu1 }
 0x1f8   : > { %645 = vst [vmem:[%s218_s13] sm:$0xff] %v642_v45 }
 0x1f9   : > { %949 = shalt.err (!%p946_p3)
}
 0x1fa   : > { %s950_s6 = scalar_lea.hbm %s1215_s17, 128  ;;  %s954_s9 = scalar_lea.hbm %s1262_s5, 256 }
 0x1fb   : > { %p951_p4 = scmp.ne.s32.totalorder %s1215_s17, %s950_s6  ;;  %p955_p9 = scmp.lt.u32.totalorder %s1215_s17, %s1262_s5 }
 0x1fc   : > { %p956_p10 = scmp.lt.u32.totalorder %s954_s9, %s950_s6  ;;  %p958_p12 = scmp.lt.u32.totalorder %s950_s6, %s1215_s17 }
 0x1fd   : > { %p952_p7 = pnand %p951_p4, %p1072_p5 }
 0x1fe   : > { %p957_p11 = por %p956_p10, %p955_p9 }
 0x1ff   : > { %p953_p8 = pneg %p952_p7 }
 0x200   : > { %p959_p13 = por %p958_p12, %p957_p11 }
 0x202   : > { %p960_p0 = pnand %p959_p13, %p953_p8 }
 0x204   : > { %963 = shalt.err (!%p960_p0)
}
 0x205   : > { %894 = dma.vmem_to_hbm [thread:$0]  (%p1072_p5), %s1217_s14, 128, %s1215_s17, %s647_s23  }
 0x206 PF: > { %p900_p1 = scmp.ge.s32.totalorder %s998_s21, 2  ;;  %s672_s12 = sand.u32 1, %s986_s18  }
 0x207   : > { %s673_s13 = scalar_lea.sflag [#allocation3], %s672_s12 }
 0x208   : > { %p897_p2 = pnand %p900_p1, %p1076_p6 }
 0x20a   : > { %981 = dma.done.wait (!%p897_p2), %s673_s13, 128  }
 0x20b   : > { %983 = vsyncadd (!%p897_p2), %s673_s13, 4294967168  ;;  %p15_p3 = scmp.ge.s32.totalorder %s1059_s24, 4   ;;  %s1265_s18 = smov %s990_s19 }
 0x20c   : > { %s1266_s19 = smov %s994_s20  ;;  %s1267_s20 = smov %s1070_s27 }
 0x20d   : > { %s1268_s21 = smov %s1059_s24  ;;  %17 = sbr.rel (!%p15_p3) target bundleno = 3 (0x3), region = 75 }
 0x214   :  { %678 = vsyncpa [#allocation3], 1 }
 0x215   :  { %680 = vsyncpa [#allocation3 + $0x1], 1 }

</bundles_post_ra>
